<compile_context>
chip_gen: v5e
topology: v5e:2x2
jax: 0.10.0
libtpu: 0.0.40
codegen_flags: <defaults>
</compile_context>

<pallas_src>
import functools

import jax
import jax.numpy as jnp
from jax.experimental import pallas as pl
from jax.experimental.pallas import tpu as pltpu

# Op names used by AdaAug (defines the projection head width = 2 * len(OPS_NAMES)).
OPS_NAMES = [
    "ShearX", "ShearY", "TranslateX", "TranslateY", "Rotate", "AutoContrast",
    "Invert", "Equalize", "Solarize", "Posterize", "Contrast", "Color",
    "Brightness", "Sharpness", "Cutout", "Identity",
]

_LANE = 128     # lane width of a vreg
_SUBLANE = 8    # f32 sublane count of a vreg


def _round_up(x: int, m: int) -> int:
    return ((x + m - 1) // m) * m


# ----------------------------------------------------------------------------
# Kernel
# ----------------------------------------------------------------------------
def _mlp_kernel(x_ref, w0_ref, *rest, n_total: int, has_rest: bool):
    """Fused MLP: out = L_{n-1}(ReLU(... ReLU(L_0(x)) ...)).

    Operands (all whole arrays resident in VMEM, no grid):
      x_ref    : (B_pad, Fin)        f32
      w0_ref   : (Fin, P)            bf16   (layer-0 weight, output-padded)
      w_rest   : (n_total-1, P, P)   bf16   (stacked weights, only if n_total > 1)
      b_ref    : (n_total, 1, P)     f32    (stacked biases)
      out_ref  : (B_pad, P)          f32

    The dot operands are bf16 (MXU-native); accumulation, bias-add and ReLU are f32.
    The intermediate activation `h` stays in vregs/VMEM between layers.
    """
    if has_rest:
        w_rest_ref, b_ref, out_ref = rest
    else:
        b_ref, out_ref = rest

    h = jnp.dot(x_ref[...].astype(jnp.bfloat16), w0_ref[...],
                preferred_element_type=jnp.float32)
    h = h + b_ref[0]                      # (1, P) broadcast over batch, f32
    for i in range(1, n_total):           # matches nn.Sequential: no ReLU after final Linear
        h = jnp.maximum(h, 0.0)
        h = jnp.dot(h.astype(jnp.bfloat16), w_rest_ref[i - 1],
                    preferred_element_type=jnp.float32)
        h = h + b_ref[i]
    out_ref[...] = h.astype(out_ref.dtype)


# ----------------------------------------------------------------------------
# Parameter init (mimics nn.Linear default) and one-time padding / stacking
# ----------------------------------------------------------------------------
def init_projection_params(key, in_features, n_layers, n_hidden=128,
                           dtype=jnp.float32):
    """Returns list of (W [F_in, F_out], b [F_out]) (pre-transposed vs. PyTorch)."""
    out_dim = 2 * len(OPS_NAMES)
    if n_layers > 0:
        dims = [in_features, n_hidden] + [n_hidden] * (n_layers - 1) + [out_dim]
    else:
        dims = [in_features, out_dim]
    params = []
    for fin, fout in zip(dims[:-1], dims[1:]):
        key, kw, kb = jax.random.split(key, 3)
        bound = 1.0 / jnp.sqrt(jnp.asarray(fin, dtype))
        w = jax.random.uniform(kw, (fin, fout), dtype, -bound, bound)
        b = jax.random.uniform(kb, (fout,), dtype, -bound, bound)
        params.append((w, b))
    return params


def prepare_projection_params(params, compute_dtype=jnp.bfloat16):
    """One-time prep: pad, cast to bf16, and stack weights/biases.

    Call this ONCE (at init); reuse the returned dict for every forward call so
    no padding ops land on the per-call critical path.
    """
    n = len(params)
    fin0 = params[0][0].shape[0]
    out_features = params[-1][0].shape[1]
    # Common padded width for every layer output / hidden dim (lane-dense, >=128).
    P = _round_up(max(w.shape[1] for w, _ in params), _LANE)

    w0 = params[0][0]
    w0_p = jnp.zeros((fin0, P), compute_dtype).at[:, :w0.shape[1]].set(
        w0.astype(compute_dtype))

    b_stack = jnp.zeros((n, 1, P), jnp.float32)
    for i, (_, b) in enumerate(params):
        b_stack = b_stack.at[i, 0, :b.shape[0]].set(b.astype(jnp.float32))

    if n > 1:
        w_rest = jnp.zeros((n - 1, P, P), compute_dtype)
        for i, (w, _) in enumerate(params[1:]):
            w_rest = w_rest.at[i, :w.shape[0], :w.shape[1]].set(
                w.astype(compute_dtype))
    else:
        w_rest = None

    return {
        "w0": w0_p, "w_rest": w_rest, "b": b_stack,
        "n_total": n, "in_features": fin0, "out_features": out_features, "P": P,
    }


# ----------------------------------------------------------------------------
# Forward
# ----------------------------------------------------------------------------
def projection_forward(x, prep):
    """Forward pass of Projection as ONE fused Pallas kernel.

    x: (B, in_features) f32; prep: output of prepare_projection_params.
    """
    B, Fin = x.shape
    assert Fin == prep["in_features"], (Fin, prep["in_features"])
    n_total = prep["n_total"]
    P = prep["P"]
    has_rest = prep["w_rest"] is not None

    B_pad = _round_up(max(B, 1), _SUBLANE)
    if B_pad != B:
        x_in = jnp.zeros((B_pad, Fin), x.dtype).at[:B].set(x)
    else:
        x_in = x   # already sublane-aligned: no per-call padding op at all

    inputs = [x_in, prep["w0"]]
    if has_rest:
        inputs.append(prep["w_rest"])
    inputs.append(prep["b"])

    # Advisory cost estimate (padded shapes; slight over-count is harmless).
    flops = 2 * B_pad * Fin * P + B_pad * P
    if has_rest:
        flops += (n_total - 1) * (2 * B_pad * P * P + B_pad * P)
    bytes_accessed = sum(a.size * a.dtype.itemsize for a in inputs)
    bytes_accessed += B_pad * P * jnp.dtype(jnp.float32).itemsize

    kernel = functools.partial(_mlp_kernel, n_total=n_total, has_rest=has_rest)
    vmem = pl.BlockSpec(memory_space=pltpu.MemorySpace.VMEM)

    out_p = pl.pallas_call(
        kernel,
        out_shape=jax.ShapeDtypeStruct((B_pad, P), jnp.float32),
        in_specs=[vmem] * len(inputs),
        out_specs=vmem,
        cost_estimate=pl.CostEstimate(
            flops=flops, transcendentals=0, bytes_accessed=bytes_accessed),
    )(*inputs)

    return out_p[:B, :prep["out_features"]]


# ----------------------------------------------------------------------------
# References
# ----------------------------------------------------------------------------
def projection_forward_ref_f32(x, params):
    """Pure f32 reference (module semantics)."""
    n = len(params)
    h = x
    for idx, (w, b) in enumerate(params):
        h = h @ w + b
        if idx < n - 1:
            h = jnp.maximum(h, 0.0)
    return h


def projection_forward_ref_bf16(x, params):
    """Reference mirroring the kernel's numerics (bf16 dot operands, f32 accum)."""
    n = len(params)
    h = x
    for idx, (w, b) in enumerate(params):
        h = jnp.dot(h.astype(jnp.bfloat16), w.astype(jnp.bfloat16),
                    preferred_element_type=jnp.float32)
        h = h + b.astype(jnp.float32)
        if idx < n - 1:
            h = jnp.maximum(h, 0.0)
    return h


if __name__ == "__main__":
    key = jax.random.PRNGKey(0)
    k_params, k_x, k_params0 = jax.random.split(key, 3)

    batch = 8
    in_features = 32
    n_layers = 2
    n_hidden = 128
    out_dim = 2 * len(OPS_NAMES)

    x = jax.random.normal(k_x, (batch, in_features), jnp.float32)

    # --- main case: n_layers = 2 (Linear+ReLU, Linear+ReLU, Linear) ---
    params = init_projection_params(k_params, in_features, n_layers, n_hidden)
    prep = prepare_projection_params(params)          # one-time padding/stacking
    out = jax.block_until_ready(projection_forward(x, prep))

    ref_bf16 = projection_forward_ref_bf16(x, params)
    ref_f32 = projection_forward_ref_f32(x, params)
    assert out.shape == (batch, out_dim), out.shape
    assert jnp.allclose(out, ref_bf16, atol=1e-2, rtol=1e-2), (
        float(jnp.max(jnp.abs(out - ref_bf16))))
    assert jnp.allclose(out, ref_f32, atol=2e-1, rtol=2e-1), (
        float(jnp.max(jnp.abs(out - ref_f32))))

    # --- degenerate case: n_layers = 0 (single Linear, no ReLU) ---
    params0 = init_projection_params(k_params0, in_features, 0, n_hidden)
    prep0 = prepare_projection_params(params0)
    out0 = jax.block_until_ready(projection_forward(x, prep0))
    ref0_bf16 = projection_forward_ref_bf16(x, params0)
    assert out0.shape == (batch, out_dim), out0.shape
    assert jnp.allclose(out0, ref0_bf16, atol=1e-2, rtol=1e-2), (
        float(jnp.max(jnp.abs(out0 - ref0_bf16))))

    print("KERNEL_OK")
</pallas_src>

<mosaic_0001>
module attributes {stable_mosaic.version = 11 : i64} {
  func.func @_mlp_kernel(%arg0: memref<8x32xf32, #tpu.memory_space<vmem>>, %arg1: memref<32x128xbf16, #tpu.memory_space<vmem>>, %arg2: memref<2x128x128xbf16, #tpu.memory_space<vmem>>, %arg3: memref<3x1x128xf32, #tpu.memory_space<vmem>>, %arg4: memref<8x128xf32, #tpu.memory_space<vmem>>) attributes {dimension_semantics = [], scalar_prefetch = 0 : i64, scratch_operands = 0 : i64, tpu.core_type = #tpu.core_type<tc>} {
    %c0 = arith.constant 0 : index
    %c0_0 = arith.constant 0 : index
    %0 = vector.load %arg0[%c0, %c0_0] : memref<8x32xf32, #tpu.memory_space<vmem>>, vector<8x32xf32>
    %1 = arith.truncf %0 : vector<8x32xf32> to vector<8x32xbf16>
    %c0_1 = arith.constant 0 : index
    %c0_2 = arith.constant 0 : index
    %2 = vector.load %arg1[%c0_1, %c0_2] : memref<32x128xbf16, #tpu.memory_space<vmem>>, vector<32x128xbf16>
    %cst = arith.constant dense<0.000000e+00> : vector<8x128xf32>
    %3 = tpu.matmul %1, %2, %cst {dimension_numbers = #tpu.dot_dimension_numbers<[1], [0], [0], [1], [0, 0, 1, 1], [], []>} : vector<8x32xbf16>, vector<32x128xbf16>, vector<8x128xf32> -> vector<8x128xf32>
    %c0_3 = arith.constant 0 : index
    %c0_4 = arith.constant 0 : index
    %c0_5 = arith.constant 0 : index
    %4 = vector.load %arg3[%c0_3, %c0_4, %c0_5] : memref<3x1x128xf32, #tpu.memory_space<vmem>>, vector<1x1x128xf32>
    %5 = vector.shape_cast %4 : vector<1x1x128xf32> to vector<1x128xf32>
    %6 = vector.broadcast %5 : vector<1x128xf32> to vector<8x128xf32>
    %7 = arith.addf %3, %6 : vector<8x128xf32>
    %cst_6 = arith.constant 0.000000e+00 : f32
    %8 = vector.broadcast %cst_6 : f32 to vector<8x128xf32>
    %9 = arith.maximumf %7, %8 : vector<8x128xf32>
    %10 = arith.truncf %9 : vector<8x128xf32> to vector<8x128xbf16>
    %c0_7 = arith.constant 0 : index
    %c0_8 = arith.constant 0 : index
    %c0_9 = arith.constant 0 : index
    %11 = vector.load %arg2[%c0_7, %c0_8, %c0_9] : memref<2x128x128xbf16, #tpu.memory_space<vmem>>, vector<1x128x128xbf16>
    %12 = vector.shape_cast %11 : vector<1x128x128xbf16> to vector<128x128xbf16>
    %cst_10 = arith.constant dense<0.000000e+00> : vector<8x128xf32>
    %13 = tpu.matmul %10, %12, %cst_10 {dimension_numbers = #tpu.dot_dimension_numbers<[1], [0], [0], [1], [0, 0, 1, 1], [], []>} : vector<8x128xbf16>, vector<128x128xbf16>, vector<8x128xf32> -> vector<8x128xf32>
    %c1 = arith.constant 1 : index
    %c0_11 = arith.constant 0 : index
    %c0_12 = arith.constant 0 : index
    %14 = vector.load %arg3[%c1, %c0_11, %c0_12] : memref<3x1x128xf32, #tpu.memory_space<vmem>>, vector<1x1x128xf32>
    %15 = vector.shape_cast %14 : vector<1x1x128xf32> to vector<1x128xf32>
    %16 = vector.broadcast %15 : vector<1x128xf32> to vector<8x128xf32>
    %17 = arith.addf %13, %16 : vector<8x128xf32>
    %cst_13 = arith.constant 0.000000e+00 : f32
    %18 = vector.broadcast %cst_13 : f32 to vector<8x128xf32>
    %19 = arith.maximumf %17, %18 : vector<8x128xf32>
    %20 = arith.truncf %19 : vector<8x128xf32> to vector<8x128xbf16>
    %c1_14 = arith.constant 1 : index
    %c0_15 = arith.constant 0 : index
    %c0_16 = arith.constant 0 : index
    %21 = vector.load %arg2[%c1_14, %c0_15, %c0_16] : memref<2x128x128xbf16, #tpu.memory_space<vmem>>, vector<1x128x128xbf16>
    %22 = vector.shape_cast %21 : vector<1x128x128xbf16> to vector<128x128xbf16>
    %cst_17 = arith.constant dense<0.000000e+00> : vector<8x128xf32>
    %23 = tpu.matmul %20, %22, %cst_17 {dimension_numbers = #tpu.dot_dimension_numbers<[1], [0], [0], [1], [0, 0, 1, 1], [], []>} : vector<8x128xbf16>, vector<128x128xbf16>, vector<8x128xf32> -> vector<8x128xf32>
    %c2 = arith.constant 2 : index
    %c0_18 = arith.constant 0 : index
    %c0_19 = arith.constant 0 : index
    %24 = vector.load %arg3[%c2, %c0_18, %c0_19] : memref<3x1x128xf32, #tpu.memory_space<vmem>>, vector<1x1x128xf32>
    %25 = vector.shape_cast %24 : vector<1x1x128xf32> to vector<1x128xf32>
    %26 = vector.broadcast %25 : vector<1x128xf32> to vector<8x128xf32>
    %27 = arith.addf %23, %26 : vector<8x128xf32>
    %c0_20 = arith.constant 0 : index
    %c0_21 = arith.constant 0 : index
    %28 = vector.load %arg4[%c0_20, %c0_21] : memref<8x128xf32, #tpu.memory_space<vmem>>, vector<8x128xf32>
    tpu.vector_store %arg4[%c0_20, %c0_21], %27 {strides = array<i32>} : memref<8x128xf32, #tpu.memory_space<vmem>>, vector<8x128xf32>,
    return
  }
}

</mosaic_0001>

<bundles_post_ra>
// kernel: tpu_custom_call.1
= control target key start
LH: loop header
LB: loop body
LE: loop exit
PB: predicated region body
PF: predicated region fallthrough
CT: control target
= control target key end

     0   :  { %9 = vsyncpa [#allocation3], 0  ;;  %s588_s0 = inlined_call_operand.hbm [shape: f32[8,32], index: 0, kind: input, shape index: {}]   ;;  %s589_s1 = inlined_call_operand.hbm [shape: bf16[32,128], index: 1, kind: input, shape index: {}]   ;;  %s590_s2 = inlined_call_operand.hbm [shape: bf16[2,128,128], index: 2, kind: input, shape index: {}]   ;;  %s591_s3 = inlined_call_operand.hbm [shape: f32[3,1,128], index: 3, kind: input, shape index: {}]   ;;  %s592_s4 = inlined_call_operand.hbm [shape: f32[8,128], index: 4, kind: output, shape index: {}]  }
   0x1   :  { %10 = vsyncpa [#allocation6], 0 }
   0x2   :  { %11 = vsyncpa [#allocation9], 0  ;;  %s28_s17 = sshll.u32 %s589_s1, 4  ;;  %s29_s17 = int_to_ptr.hbm [resolvable:$true] %s28_s17 }
   0x3   :  { %12 = vsyncpa [#allocation4], 0  ;;  %s539_s18 = smov [#allocation5]   ;;  %s18_s22 = sshll.u32 %s588_s0, 4  ;;  %s19_s22 = int_to_ptr.hbm [resolvable:$true] %s18_s22 }
   0x4   :  { %s30_s19 = sshll.u32 %s539_s18, 4  ;;  %s540_s23 = smov 64   ;;  %s31_s19 = int_to_ptr.vmem [resolvable:$true] %s30_s19 }
   0x5   :  { %s541_s24 = smov 4   ;;  %s542_s25 = smov [#allocation2]  }
   0x6   :  { %36 = dma.hbm_to_vmem [thread:$0]  %s29_s17, 256, %s31_s19, [#allocation6], %s540_s23, %s540_s23, %s541_s24  }
   0x7   :  { %s20_s26 = sshll.u32 %s542_s25, 4  ;;  %s41_s29 = sshll.u32 %s590_s2, 4  ;;  %s21_s26 = int_to_ptr.vmem [resolvable:$true] %s20_s26  ;;  %s42_s29 = int_to_ptr.hbm [resolvable:$true] %s41_s29 }
   0x8   :  { %23 = dma.hbm_to_vmem [thread:$0]  %s19_s22, 128, %s21_s26, [#allocation3]  }
   0x9   :  { %s54_s5 = sshll.u32 %s591_s3, 4  ;;  %s543_s6 = smov [#allocation7]   ;;  %s55_s5 = int_to_ptr.hbm [resolvable:$true] %s54_s5 }
   0xa   :  { %s43_s7 = sshll.u32 %s543_s6, 4  ;;  %s544_s0 = smov [#allocation8]   ;;  %s44_s7 = int_to_ptr.vmem [resolvable:$true] %s43_s7 }
   0xb   :  { %49 = dma.hbm_to_vmem [thread:$0]  %s42_s29, 2048, %s44_s7, [#allocation6], %s540_s23, %s540_s23, %s541_s24  }
   0xc   :  { %s56_s8 = sshll.u32 %s544_s0, 4  ;;  %s545_s9 = smov 16   ;;  %s57_s8 = int_to_ptr.vmem [resolvable:$true] %s56_s8 }
   0xd   :  { %s546_s10 = smov 1  }
   0xe   :  { %62 = dma.hbm_to_vmem [thread:$0]  %s55_s5, 48, %s57_s8, [#allocation9], %s545_s9, %s545_s9, %s546_s10  }
   0xf   :  { %531 = dma.done.wait [#allocation3], 128  }
  0x10   :  { %532 = vsyncadd [#allocation3], 4294967168 }
  0x11   :  { %533 = dma.done.wait [#allocation6], 2304  }
  0x12   :  { %534 = vsyncadd [#allocation6], 4294964992 }
  0x13   :  { %535 = dma.done.wait [#allocation9], 48  }
  0x14   :  { %536 = vsyncadd [#allocation9], 4294967248  ;;  %v382_v0 = vld [vmem:[#allocation5 + $0x8] sm:$0xff]  ;;  %v381_v2 = vld [vmem:[#allocation5] sm:$0xff]  ;;  %vm102_vm0 = vcmask 261120   ;;  %s547_s2 = smov [#allocation10]  }
  0x15   :  { %v390_v1 = vld [vmem:[#allocation7 + $0x38] sm:$0xff]  ;;  %112 = vmatpush.bf16.msra.mxu0 %v382_v0  ;;  %v80_v3 = vld [vmem:[#allocation2] sm:$0xff]  ;;  %v389_v4 = vld [vmem:[#allocation7 + $0x30] sm:$0xff]  ;;  %s294_s3 = sshll.u32 %s547_s2, 4  ;;  %s296_s13 = sshll.u32 %s592_s4, 4  ;;  %s295_s3 = int_to_ptr.vmem [resolvable:$true] %s294_s3  ;;  %s297_s13 = int_to_ptr.hbm [resolvable:$true] %s296_s13 }
  0x16   :  { %190 = vmatpush.bf16.msra.mxu1 %v390_v1  ;;  %v81_v5 = vpack.c.bf16 %v80_v3, %v80_v3  ;;  %v388_v6 = vld [vmem:[#allocation7 + $0x28] sm:$0xff]  ;;  %v387_v7 = vld [vmem:[#allocation7 + $0x20] sm:$0xff]  ;;  %v386_v8 = vld [vmem:[#allocation7 + $0x18] sm:$0xff] }
  0x17   :  { %v385_v9 = vld [vmem:[#allocation7 + $0x10] sm:$0xff]  ;;  %v384_v10 = vld [vmem:[#allocation7 + $0x8] sm:$0xff]  ;;  %v383_v11 = vld [vmem:[#allocation7] sm:$0xff] }
  0x18   :  { %v398_v12 = vld [vmem:[#allocation7 + $0x78] sm:$0xff]  ;;  %v397_v13 = vld [vmem:[#allocation7 + $0x70] sm:$0xff]  ;;  %v396_v14 = vld [vmem:[#allocation7 + $0x68] sm:$0xff] }
  0x19   :  { %113 = vmatpush.bf16.msra.mxu0 %v381_v2  ;;  %275 = vmatpush.bf16.msra.mxu2 %v398_v12  ;;  %v395_v15 = vld [vmem:[#allocation7 + $0x60] sm:$0xff]  ;;  %v394_v16 = vld [vmem:[#allocation7 + $0x58] sm:$0xff]  ;;  %v393_v17 = vld [vmem:[#allocation7 + $0x50] sm:$0xff] }
  0x1a   :  { %191 = vmatpush.bf16.msra.mxu1 %v389_v4  ;;  %v408_v18 = vld [vmem:[#allocation8] ss:$0 sm:$0xff]  ;;  %v392_v24 = vld [vmem:[#allocation7 + $0x48] sm:$0xff]  ;;  %v409_v26 = vld [vmem:[#allocation8 + $0x1] ss:$0 sm:$0xff] }
  0x1b   :  { %v391_v25 = vld [vmem:[#allocation7 + $0x40] sm:$0xff] }
  0x1c   :  { %316 = vmatmul.msk.bf16.vlgmr.msra.gmra.mxu0 %vm102_vm0, %v81_v5  ;;  %v410_v32 = vld [vmem:[#allocation8 + $0x2] ss:$0 sm:$0xff] }
  0x1d   :  { %276 = vmatpush.bf16.msra.mxu2 %v397_v13 }
  0x1e   :  { %192 = vmatpush.bf16.msra.mxu1 %v388_v6 }
  0x21   :  { %277 = vmatpush.bf16.msra.mxu2 %v396_v14 }
  0x22   :  { %193 = vmatpush.bf16.msra.mxu1 %v387_v7 }
  0x25   :  { %278 = vmatpush.bf16.msra.mxu2 %v395_v15 }
  0x26   :  { %194 = vmatpush.bf16.msra.mxu1 %v386_v8 }
  0x29   :  { %279 = vmatpush.bf16.msra.mxu2 %v394_v16 }
  0x2a   :  { %195 = vmatpush.bf16.msra.mxu1 %v385_v9 }
  0x2d   :  { %280 = vmatpush.bf16.msra.mxu2 %v393_v17 }
  0x2e   :  { %196 = vmatpush.bf16.msra.mxu1 %v384_v10 }
  0x31   :  { %281 = vmatpush.bf16.msra.mxu2 %v392_v24 }
  0x32   :  { %197 = vmatpush.bf16.msra.mxu1 %v383_v11 }
  0x35   :  { %282 = vmatpush.bf16.msra.mxu2 %v391_v25 }
  0x99   :  { %v115_v19 = vpop.f32.mrf.mxu0 }
  0x9a   :  { %v116_v20 = vadd.f32 %v408_v18, %v115_v19 }
  0x9c   :  { %v119_v21 = vmax.f32 %v116_v20, 0.0 }
  0x9e   :  { %v120_v22 = vpack.c.bf16 %v119_v21, %v119_v21 }
  0xa0   :  { %198 = vmatmul.bf16.vlgmr.msra.gmra.mxu1 %v120_v22 }
  0xa1   :  { %v117_v23 = vpop.f32.mrf.mxu0 }
 0x11d   :  { %v199_v27 = vpop.f32.mrf.mxu1 }
 0x11e   :  { %v200_v28 = vadd.f32 %v409_v26, %v199_v27 }
 0x120   :  { %v203_v29 = vmax.f32 %v200_v28, 0.0 }
 0x122   :  { %v204_v30 = vpack.c.bf16 %v203_v29, %v203_v29 }
 0x124   :  { %283 = vmatmul.bf16.vlgmr.msra.gmra.mxu2 %v204_v30 }
 0x125   :  { %v201_v31 = vpop.f32.mrf.mxu1 }
 0x1a7   :  { %v284_v33 = vpop.f32.mrf.mxu2 }
 0x1a8   :  { %v285_v34 = vadd.f32 %v410_v32, %v284_v33 }
 0x1aa   :  { %288 = vst [vmem:[#allocation10] sm:$0xff] %v285_v34 }
 0x1ab   :  { %299 = dma.vmem_to_hbm [thread:$0]  %s295_s3, 128, %s297_s13, [#allocation4]  }
 0x1af   :  { %v286_v35 = vpop.f32.mrf.mxu2 }
 0x1b0   :  { %537 = dma.done.wait [#allocation4], 128  }
 0x1b1   :  { %538 = vsyncadd [#allocation4], 4294967168 }
 0x1b2   :  { %304 = vsyncpa [#allocation3], 1 }
 0x1b3   :  { %305 = vsyncpa [#allocation6], 1 }
 0x1b4   :  { %306 = vsyncpa [#allocation9], 1 }
 0x1b5   :  { %307 = vsyncpa [#allocation4], 1 }

</bundles_post_ra>
